<compile_context>
chip_gen: v7x
topology: tpu7x:2x2x1
jax: 0.10.0
libtpu: 0.0.40
codegen_flags: <defaults>
</compile_context>

<pallas_src>
import jax
import jax.numpy as jnp
from jax import lax
from jax.experimental import pallas as pl
from jax.experimental.pallas import tpu as pltpu

HIDDEN = 512
N_OUT = 10


def label_predictor_kernel(x_ref, w12_ref, w3_ref, b_ref, out_ref, h_scr):
    # x_ref  : (B, 512)      f32   input activations (resident block)
    # w12_ref: (1, 512, 512) bf16  hidden-layer weight for this grid step, (in, out)
    # w3_ref : (10, 512)     bf16  final weight, PyTorch-native (out, in), lane-dense
    # b_ref  : (3, 512)      f32   row0=b1, row1=b2, row2[:10]=b3 (rest zero)
    # out_ref: (B, 10)       f32
    # h_scr  : (B, 512)      f32   activation carried across the layer-grid axis
    i = pl.program_id(0)

    @pl.when(i == 0)
    def _():
        h_scr[...] = x_ref[...]

    # Hidden layer i: bf16 operands straight to the MXU, f32 accumulate.
    w = w12_ref[0]                                              # (512, 512) bf16
    b = jnp.where(i == 0, b_ref[0:1, :], b_ref[1:2, :])         # (1, 512) f32
    h = jnp.dot(h_scr[...].astype(jnp.bfloat16), w,
                preferred_element_type=jnp.float32) + b
    h_scr[...] = jnp.maximum(h, 0.0)

    @pl.when(i == pl.num_programs(0) - 1)
    def _():
        # Layer 3: Linear(512 -> 10). Weight kept compact as (10, 512);
        # contract dim 1 of both operands (transposed-RHS matmul on the MXU).
        y = lax.dot_general(
            h_scr[...].astype(jnp.bfloat16), w3_ref[...],
            dimension_numbers=(((1,), (1,)), ((), ())),
            preferred_element_type=jnp.float32)                 # (B, 10) f32
        out_ref[...] = y + b_ref[2:3, :N_OUT]


def init_params(key):
    """PyTorch-style init U(-1/sqrt(fan_in), 1/sqrt(fan_in)), then packed:
       w12  : (2, 512, 512) bf16  hidden weights stored (in, out)
             (transpose of PyTorch's (out, in) so the kernel computes h @ W)
       w3t  : (10, 512)     bf16  final weight in PyTorch-native (out, in)
       bpack: (3, 512)      f32   b1 | b2 | b3 (b3 zero-padded to 512)
    """
    bound = 1.0 / jnp.sqrt(jnp.float32(HIDDEN))
    k1, k2, k3, k4, k5, k6 = jax.random.split(key, 6)
    w1 = jax.random.uniform(k1, (HIDDEN, HIDDEN), jnp.float32, -bound, bound)
    b1 = jax.random.uniform(k2, (HIDDEN,), jnp.float32, -bound, bound)
    w2 = jax.random.uniform(k3, (HIDDEN, HIDDEN), jnp.float32, -bound, bound)
    b2 = jax.random.uniform(k4, (HIDDEN,), jnp.float32, -bound, bound)
    w3 = jax.random.uniform(k5, (N_OUT, HIDDEN), jnp.float32, -bound, bound)
    b3 = jax.random.uniform(k6, (N_OUT,), jnp.float32, -bound, bound)

    w12 = jnp.stack([w1, w2], axis=0).astype(jnp.bfloat16)   # (2, 512, 512)
    w3t = w3.astype(jnp.bfloat16)                            # (10, 512)
    bpack = jnp.zeros((3, HIDDEN), jnp.float32)
    bpack = bpack.at[0, :].set(b1).at[1, :].set(b2).at[2, :N_OUT].set(b3)
    return (w12, w3t, bpack)


def label_predictor_forward(x, params):
    w12, w3t, bpack = params
    B = x.shape[0]
    flops = 2 * B * (2 * HIDDEN * HIDDEN + HIDDEN * N_OUT)
    bytes_accessed = (x.size * 4 + w12.size * 2 + w3t.size * 2
                      + bpack.size * 4 + B * N_OUT * 4)
    return pl.pallas_call(
        label_predictor_kernel,
        out_shape=jax.ShapeDtypeStruct((B, N_OUT), jnp.float32),
        grid_spec=pltpu.PrefetchScalarGridSpec(
            num_scalar_prefetch=0,
            grid=(2,),  # one step per hidden layer; layer-2 weights prefetch
            in_specs=[
                pl.BlockSpec((B, HIDDEN), lambda i: (0, 0)),            # x
                pl.BlockSpec((1, HIDDEN, HIDDEN), lambda i: (i, 0, 0)),  # w12[i]
                pl.BlockSpec((N_OUT, HIDDEN), lambda i: (0, 0)),        # w3 (compact)
                pl.BlockSpec((3, HIDDEN), lambda i: (0, 0)),            # biases
            ],
            out_specs=pl.BlockSpec((B, N_OUT), lambda i: (0, 0)),
            scratch_shapes=[pltpu.VMEM((B, HIDDEN), jnp.float32)],
        ),
        compiler_params=pltpu.CompilerParams(
            dimension_semantics=("arbitrary",)),  # layers are sequential
        cost_estimate=pl.CostEstimate(flops=flops, transcendentals=0,
                                      bytes_accessed=bytes_accessed),
    )(x, w12, w3t, bpack)


def reference_forward(x, params):
    """Pure-JAX reference: f32 math with the same bf16-rounded weights."""
    w12, w3t, bpack = params
    w1 = w12[0].astype(jnp.float32)
    w2 = w12[1].astype(jnp.float32)
    w3 = w3t.astype(jnp.float32)              # (10, 512)
    b1, b2, b3 = bpack[0], bpack[1], bpack[2, :N_OUT]
    h = jnp.maximum(x @ w1 + b1, 0.0)
    h = jnp.maximum(h @ w2 + b2, 0.0)
    return h @ w3.T + b3


if __name__ == "__main__":
    key = jax.random.PRNGKey(0)
    key, kx, kp = jax.random.split(key, 3)

    B = 8  # small batch; feature width fixed at 512 by the module
    x = jax.random.normal(kx, (B, HIDDEN), jnp.float32)
    params = init_params(kp)

    y = label_predictor_forward(x, params)
    jax.block_until_ready(y)

    y_ref = reference_forward(x, params)
    assert y.shape == (B, N_OUT)
    # Tolerance covers the documented precision choice: activations are
    # rounded to bf16 before each MXU matmul (f32 accumulation), vs the
    # f32-activation reference above.
    assert jnp.allclose(y, y_ref, atol=2e-2, rtol=2e-2), (
        float(jnp.max(jnp.abs(y - y_ref))))

    print("KERNEL_OK")
</pallas_src>

<mosaic_0001>
module attributes {stable_mosaic.version = 11 : i64} {
  func.func @label_predictor_kernel(%arg0: i32, %arg1: memref<8x512xf32, #tpu.memory_space<vmem>>, %arg2: memref<1x512x512xbf16, #tpu.memory_space<vmem>>, %arg3: memref<10x512xbf16, #tpu.memory_space<vmem>>, %arg4: memref<3x512xf32, #tpu.memory_space<vmem>>, %arg5: memref<8x10xf32, #tpu.memory_space<vmem>>, %arg6: memref<8x512xf32, #tpu.memory_space<vmem>>) attributes {dimension_semantics = [#tpu.dimension_semantics<arbitrary>], iteration_bounds = array<i64: 2>, scalar_prefetch = 0 : i64, scratch_operands = 1 : i64, tpu.core_type = #tpu.core_type<tc>, window_params = [{pipeline_mode = #tpu.pipeline_mode<synchronous>, transform_indices = @transform_0, window_bounds = array<i64: 8, 512>}, {transform_indices = @transform_1, window_bounds = array<i64: 1, 512, 512>}, {pipeline_mode = #tpu.pipeline_mode<synchronous>, transform_indices = @transform_2, window_bounds = array<i64: 10, 512>}, {pipeline_mode = #tpu.pipeline_mode<synchronous>, transform_indices = @transform_3, window_bounds = array<i64: 3, 512>}, {pipeline_mode = #tpu.pipeline_mode<synchronous>, transform_indices = @transform_4, window_bounds = array<i64: 8, 10>}]} {
    %c0_i32 = arith.constant 0 : i32
    %0 = arith.cmpi eq, %arg0, %c0_i32 : i32
    %1 = arith.extui %0 : i1 to i32
    %c0_i32_0 = arith.constant 0 : i32
    %2 = arith.cmpi ne, %1, %c0_i32_0 : i32
    scf.if %2 {
      %c0_13 = arith.constant 0 : index
      %c0_14 = arith.constant 0 : index
      %20 = vector.load %arg1[%c0_13, %c0_14] : memref<8x512xf32, #tpu.memory_space<vmem>>, vector<8x512xf32>
      %c0_15 = arith.constant 0 : index
      %c0_16 = arith.constant 0 : index
      %21 = vector.load %arg6[%c0_15, %c0_16] : memref<8x512xf32, #tpu.memory_space<vmem>>, vector<8x512xf32>
      tpu.vector_store %arg6[%c0_15, %c0_16], %20 {strides = array<i32>} : memref<8x512xf32, #tpu.memory_space<vmem>>, vector<8x512xf32>,
    } else {
    }
    %c0 = arith.constant 0 : index
    %c0_1 = arith.constant 0 : index
    %c0_2 = arith.constant 0 : index
    %3 = vector.load %arg2[%c0, %c0_1, %c0_2] : memref<1x512x512xbf16, #tpu.memory_space<vmem>>, vector<1x512x512xbf16>
    %4 = vector.shape_cast %3 : vector<1x512x512xbf16> to vector<512x512xbf16>
    %c0_i32_3 = arith.constant 0 : i32
    %5 = arith.cmpi eq, %arg0, %c0_i32_3 : i32
    %c0_4 = arith.constant 0 : index
    %c0_5 = arith.constant 0 : index
    %6 = vector.load %arg4[%c0_4, %c0_5] : memref<3x512xf32, #tpu.memory_space<vmem>>, vector<1x512xf32>
    %c1 = arith.constant 1 : index
    %c0_6 = arith.constant 0 : index
    %7 = vector.load %arg4[%c1, %c0_6] : memref<3x512xf32, #tpu.memory_space<vmem>>, vector<1x512xf32>
    %8 = arith.select %5, %6, %7 : vector<1x512xf32>
    %c0_7 = arith.constant 0 : index
    %c0_8 = arith.constant 0 : index
    %9 = vector.load %arg6[%c0_7, %c0_8] : memref<8x512xf32, #tpu.memory_space<vmem>>, vector<8x512xf32>
    %10 = arith.truncf %9 : vector<8x512xf32> to vector<8x512xbf16>
    %cst = arith.constant dense<0.000000e+00> : vector<8x512xf32>
    %11 = tpu.matmul %10, %4, %cst {dimension_numbers = #tpu.dot_dimension_numbers<[1], [0], [0], [1], [0, 0, 1, 1], [], []>} : vector<8x512xbf16>, vector<512x512xbf16>, vector<8x512xf32> -> vector<8x512xf32>
    %12 = vector.broadcast %8 : vector<1x512xf32> to vector<8x512xf32>
    %13 = arith.addf %11, %12 : vector<8x512xf32>
    %cst_9 = arith.constant 0.000000e+00 : f32
    %14 = vector.broadcast %cst_9 : f32 to vector<8x512xf32>
    %15 = arith.maximumf %13, %14 : vector<8x512xf32>
    %c0_10 = arith.constant 0 : index
    %c0_11 = arith.constant 0 : index
    %16 = vector.load %arg6[%c0_10, %c0_11] : memref<8x512xf32, #tpu.memory_space<vmem>>, vector<8x512xf32>
    tpu.vector_store %arg6[%c0_10, %c0_11], %15 {strides = array<i32>} : memref<8x512xf32, #tpu.memory_space<vmem>>, vector<8x512xf32>,
    %c1_i32 = arith.constant 1 : i32
    %17 = arith.cmpi eq, %arg0, %c1_i32 : i32
    %18 = arith.extui %17 : i1 to i32
    %c0_i32_12 = arith.constant 0 : i32
    %19 = arith.cmpi ne, %18, %c0_i32_12 : i32
    scf.if %19 {
      %c0_13 = arith.constant 0 : index
      %c0_14 = arith.constant 0 : index
      %20 = vector.load %arg6[%c0_13, %c0_14] : memref<8x512xf32, #tpu.memory_space<vmem>>, vector<8x512xf32>
      %21 = arith.truncf %20 : vector<8x512xf32> to vector<8x512xbf16>
      %c0_15 = arith.constant 0 : index
      %c0_16 = arith.constant 0 : index
      %22 = vector.load %arg3[%c0_15, %c0_16] : memref<10x512xbf16, #tpu.memory_space<vmem>>, vector<10x512xbf16>
      %cst_17 = arith.constant dense<0.000000e+00> : vector<8x10xf32>
      %23 = tpu.matmul %21, %22, %cst_17 {dimension_numbers = #tpu.dot_dimension_numbers<[1], [1], [0], [0], [0, 0, 1, 0], [], []>} : vector<8x512xbf16>, vector<10x512xbf16>, vector<8x10xf32> -> vector<8x10xf32>
      %c2 = arith.constant 2 : index
      %c0_18 = arith.constant 0 : index
      %24 = vector.load %arg4[%c2, %c0_18] : memref<3x512xf32, #tpu.memory_space<vmem>>, vector<1x10xf32>
      %25 = vector.broadcast %24 : vector<1x10xf32> to vector<8x10xf32>
      %26 = arith.addf %23, %25 : vector<8x10xf32>
      %c0_19 = arith.constant 0 : index
      %c0_20 = arith.constant 0 : index
      %27 = vector.load %arg5[%c0_19, %c0_20] : memref<8x10xf32, #tpu.memory_space<vmem>>, vector<8x10xf32>
      tpu.vector_store %arg5[%c0_19, %c0_20], %26 {strides = array<i32>} : memref<8x10xf32, #tpu.memory_space<vmem>>, vector<8x10xf32>,
    } else {
    }
    return
  }
  func.func @transform_0(%arg0: i32) -> (i32, i32) {
    %c0_i32 = arith.constant 0 : i32
    %c0_i32_0 = arith.constant 0 : i32
    %c0_i32_1 = arith.constant 0 : i32
    return %c0_i32, %c0_i32_0 : i32, i32
  }
  func.func @transform_1(%arg0: i32) -> (i32, i32, i32) {
    %c0_i32 = arith.constant 0 : i32
    %c0_i32_0 = arith.constant 0 : i32
    %c0_i32_1 = arith.constant 0 : i32
    return %arg0, %c0_i32, %c0_i32_0 : i32, i32, i32
  }
  func.func @transform_2(%arg0: i32) -> (i32, i32) {
    %c0_i32 = arith.constant 0 : i32
    %c0_i32_0 = arith.constant 0 : i32
    %c0_i32_1 = arith.constant 0 : i32
    return %c0_i32, %c0_i32_0 : i32, i32
  }
  func.func @transform_3(%arg0: i32) -> (i32, i32) {
    %c0_i32 = arith.constant 0 : i32
    %c0_i32_0 = arith.constant 0 : i32
    %c0_i32_1 = arith.constant 0 : i32
    return %c0_i32, %c0_i32_0 : i32, i32
  }
  func.func @transform_4(%arg0: i32) -> (i32, i32) {
    %c0_i32 = arith.constant 0 : i32
    %c0_i32_0 = arith.constant 0 : i32
    %c0_i32_1 = arith.constant 0 : i32
    return %c0_i32, %c0_i32_0 : i32, i32
  }
}

</mosaic_0001>

<bundles_post_ra>
// kernel: tpu_custom_call.1
= control target key start
LH: loop header
LB: loop body
LE: loop exit
PB: predicated region body
PF: predicated region fallthrough
CT: control target
= control target key end

     0   :  { %9 = vsyncpa [#allocation4], 0  ;;  %s2475_s0 = inlined_call_operand.hbm [shape: f32[8,512], index: 0, kind: input, shape index: {}]   ;;  %s2476_s1 = inlined_call_operand.hbm [shape: bf16[2,512,512], index: 1, kind: input, shape index: {}]   ;;  %s2477_s2 = inlined_call_operand.hbm [shape: bf16[10,512], index: 2, kind: input, shape index: {}]   ;;  %s2478_s3 = inlined_call_operand.hbm [shape: f32[3,512], index: 3, kind: input, shape index: {}]   ;;  %s2479_s4 = inlined_call_operand.hbm [shape: f32[8,10], index: 4, kind: output, shape index: {}]  }
   0x1   :  { %10 = vsyncpa [#allocation7], 0 }
   0x2   :  { %12 = vsyncpa [#allocation7 + $0x1], 0 }
   0x3   :  { %13 = vsyncpa [#allocation10], 0 }
   0x4   :  { %14 = vsyncpa [#allocation5], 0  ;;  %s2113_s15 = smov 0   ;;  %s2115_s16 = smov 0  }
   0x5   :  { %s2117_s17 = smov 0   ;;  %s2119_s18 = smov 0  }
   0x6 LB: > { %s2132_s19 = sadd.s32 4294967295, %s2079_s18   ;;  %s2135_s20 = sadd.s32 1, %s2079_s18   ;;  %s2079_s18 = sphi %s2119_s18, %s2506_s18   ;;  %s2075_s17 = sphi %s2117_s17, %s2505_s17   ;;  %s2071_s16 = sphi %s2115_s16, %s2504_s16   ;;  %s2067_s15 = sphi %s2113_s15, %s2503_s15  }
   0x7   : > { %s45_s21 = ssub.s32 %s2079_s18, %s2135_s20  ;;  %s48_s22 = sadd.s32 1, %s2075_s17 }
   0x8   : > { %p46_p0 = scmp.eq.s32.totalorder %s45_s21, 0  ;;  %p55_p1 = scmp.ne.s32.totalorder %s2075_s17, %s2071_s16 }
   0x9   : > { %p56_p2 = scmp.eq.s32.totalorder %s2079_s18, 0  ;;  %p61_p3 = scmp.ne.s32.totalorder %s2071_s16, %s2067_s15 }
   0xa   : > { %s2145_s23 = scalar_select %p46_p0, %s2075_s17, %s48_s22  }
   0xb   : > { %p2147_p4 = por %p56_p2, %p55_p1  ;;  %p2480_p5 = scmp.eq.s32.totalorder %s2132_s19, 0 }
   0xc   : > { %2484 = sst [smem:[#allocation17_spill]] %s2145_s23  ;;  %p1445_p6 = scmp.ge.s32.totalorder %s2079_s18, 1 }
   0xd   : > { %p135_p7 = scmp.lt.s32.totalorder %s2079_s18, 3  ;;  %p2156_p8 = por %p2480_p5, %p61_p3 }
   0xe   : > { %s2081_s27 = smov [#allocation8]   ;;  %p1647_p13 = scmp.lt.s32.totalorder %s2079_s18, 2 }
   0xf   : > { %s2486_s25 = scalar_select %p2156_p8, 1, 0 }
  0x10   : > { %p2161_p10 = pnand %p1445_p6, %p135_p7  ;;  %s158_s28 = sshll.u32 %s2081_s27, 4  ;;  %s159_s28 = int_to_ptr.vmem [resolvable:$true] %s158_s28 }
  0x11   : > { %p2176_p0 = pnand %p1647_p13, %p2147_p4  ;;  %s1889_s7 = scalar_lea.hbm %s2477_s2, 512 }
  0x12   : > { %s2487_s26 = scalar_select %p2161_p10, 1, 0 }
  0x13   : > { %p1630_p11 = pneg %p2161_p10  ;;  %p1890_p1 = scmp.ne.s32.totalorder %s2477_s2, %s1889_s7 }
  0x14   : > { %s2489_s30 = scalar_select %p2176_p0, 1, 0 }
  0x15   : > { %p2169_p12 = pnand %p1630_p11, %p2480_p5  ;;  %p1896_p6 = scmp.lt.u32.totalorder %s1889_s7, %s2477_s2 }
  0x17   : > { %p2188_p2 = pneg %p2169_p12 }
  0x19   : > { %p1892_p3 = pnand %p2188_p2, %p1890_p1 }
  0x1b   : > { %p1893_p4 = pneg %p1892_p3 }
  0x1d   : > { %p1898_p7 = pnand %p1896_p6, %p1893_p4 }
  0x1f   : > { %1901 = shalt.err (!%p1898_p7)
}
  0x20   : > { %s1902_s13 = scalar_lea.vmem %s159_s28, 512  ;;  %p1910_p5 = scmp.lt.s32.totalorder %s159_s28, %s159_s28 }
  0x21   : > { %p1903_p11 = scmp.ne.s32.totalorder %s159_s28, %s1902_s13  ;;  %p1911_p8 = scmp.lt.s32.totalorder %s1902_s13, %s1902_s13 }
  0x23   : > { %p1905_p13 = pnand %p1903_p11, %p2188_p2  ;;  %p1912_p10 = por %p1911_p8, %p1910_p5 }
  0x25   : > { %p1906_p9 = pneg %p1905_p13 }
  0x27   : > { %p1913_p0 = pnand %p1912_p10, %p1906_p9 }
  0x29   : > { %1916 = shalt.err (!%p1913_p0)
}
  0x2a   : > { %s2082_s14 = smov 256   ;;  %s2083_s15 = smov 16  }
  0x2b   : > { %1636 = dma.hbm_to_vmem [thread:$0]  (!%p2169_p12), %s2477_s2, 512, %s159_s28, [#allocation7], %s2082_s14, %s2082_s14, %s2083_s15  }
  0x2c   : > { %s2084_s24 = smov [#allocation3]   ;;  %s2085_s5 = smov [#allocation9]  }
  0x2d   : > { %s148_s27 = sshll.u32 %s2084_s24, 4  ;;  %s172_s6 = sshll.u32 %s2085_s5, 4  ;;  %s149_s27 = int_to_ptr.vmem [resolvable:$true] %s148_s27  ;;  %s173_s6 = int_to_ptr.vmem [resolvable:$true] %s172_s6 }
  0x2e   : > { %s1917_s9 = scalar_lea.hbm %s2475_s0, 512 }
  0x2f   : > { %p1918_p5 = scmp.ne.s32.totalorder %s2475_s0, %s1917_s9  ;;  %p1924_p10 = scmp.lt.u32.totalorder %s1917_s9, %s2475_s0 }
  0x31   : > { %p1920_p8 = pnand %p1918_p5, %p2188_p2 }
  0x33   : > { %p1921_p9 = pneg %p1920_p8 }
  0x35   : > { %p1926_p0 = pnand %p1924_p10, %p1921_p9 }
  0x37   : > { %1929 = shalt.err (!%p1926_p0)
}
  0x38   : > { %s1930_s28 = scalar_lea.vmem %s149_s27, 512  ;;  %p1938_p6 = scmp.lt.s32.totalorder %s149_s27, %s149_s27 }
  0x39   : > { %p1931_p1 = scmp.ne.s32.totalorder %s149_s27, %s1930_s28  ;;  %p1939_p7 = scmp.lt.s32.totalorder %s1930_s28, %s1930_s28 }
  0x3b   : > { %p1933_p3 = pnand %p1931_p1, %p2188_p2  ;;  %p1940_p11 = por %p1939_p7, %p1938_p6 }
  0x3d   : > { %p1934_p4 = pneg %p1933_p3 }
  0x3f   : > { %p1941_p13 = pnand %p1940_p11, %p1934_p4 }
  0x41   : > { %1944 = shalt.err (!%p1941_p13)
}
  0x42   : > { %1633 = dma.hbm_to_vmem [thread:$0]  (!%p2169_p12), %s2475_s0, 512, %s149_s27, [#allocation4]  }
  0x43   : > { %s183_s23 = sand.u32 1, %s2079_s18   ;;  %s1945_s7 = scalar_lea.hbm %s2478_s3, 256 }
  0x44   : > { %p1946_p5 = scmp.ne.s32.totalorder %s2478_s3, %s1945_s7  ;;  %p1952_p10 = scmp.lt.u32.totalorder %s1945_s7, %s2478_s3 }
  0x46   : > { %p1948_p8 = pnand %p1946_p5, %p2188_p2 }
  0x48   : > { %p1949_p9 = pneg %p1948_p8 }
  0x4a   : > { %p1954_p0 = pnand %p1952_p10, %p1949_p9 }
  0x4c   : > { %1957 = shalt.err (!%p1954_p0)
}
  0x4d   : > { %s1958_s27 = scalar_lea.vmem %s173_s6, 256  ;;  %p1966_p6 = scmp.lt.s32.totalorder %s173_s6, %s173_s6 }
  0x4e   : > { %p1959_p1 = scmp.ne.s32.totalorder %s173_s6, %s1958_s27  ;;  %p1967_p7 = scmp.lt.s32.totalorder %s1958_s27, %s1958_s27 }
  0x50   : > { %p1961_p3 = pnand %p1959_p1, %p2188_p2  ;;  %p1968_p11 = por %p1967_p7, %p1966_p6 }
  0x52   : > { %p1962_p4 = pneg %p1961_p3 }
  0x54   : > { %p1969_p13 = pnand %p1968_p11, %p1962_p4 }
  0x56   : > { %1972 = shalt.err (!%p1969_p13)
}
  0x57   : > { %1639 = dma.hbm_to_vmem [thread:$0]  (!%p2169_p12), %s2478_s3, 256, %s173_s6, [#allocation10]  }
  0x58   : > { %s185_s21 = sand.u32 1, %s2075_s17   ;;  %s1597_s10 = sshll.u32 %s2079_s18, 14 }
  0x59   : > { %s1450_s22 = sshll.u32 %s185_s21, 10  ;;  %s2249_s7 = scalar_lea.hbm %s2476_s1, %s1597_s10 }
  0x5a   : > { %s187_s29 = scalar_lea.vmem [#allocation6], %s1450_s22  ;;  %s2253_s9 = scalar_lea.sflag [#allocation7], %s183_s23 }
  0x5b   : > { %s194_s8 = sshll.u32 %s187_s29, 4  ;;  %s1973_s11 = scalar_lea.hbm %s2249_s7, 16384  ;;  %s2251_s8 = int_to_ptr.vmem [resolvable:$true] %s194_s8 }
  0x5c   : > { %p1974_p12 = scmp.ne.s32.totalorder %s2249_s7, %s1973_s11  ;;  %p2491_p2 = scmp.ne.s32.totalorder %s2489_s30, 0 }
  0x5d   : > { %s1978_s12 = scalar_lea.hbm %s2476_s1, 32768  ;;  %p1979_p10 = scmp.lt.u32.totalorder %s2249_s7, %s2476_s1 }
  0x5e   : > { %p1975_p5 = pneg %p2491_p2  ;;  %p1980_p0 = scmp.lt.u32.totalorder %s1978_s12, %s1973_s11 }
  0x5f   : > { %p1982_p3 = scmp.lt.u32.totalorder %s1973_s11, %s2249_s7 }
  0x60   : > { %p1976_p8 = pnand %p1975_p5, %p1974_p12  ;;  %p1981_p1 = por %p1980_p0, %p1979_p10 }
  0x62   : > { %p1977_p9 = pneg %p1976_p8  ;;  %p1983_p4 = por %p1982_p3, %p1981_p1 }
  0x64   : > { %p1984_p6 = pnand %p1983_p4, %p1977_p9 }
  0x66   : > { %1987 = shalt.err (!%p1984_p6)
}
  0x67   : > { %s1988_s23 = scalar_lea.vmem %s2251_s8, 16384  ;;  %s2086_s28 = smov [#allocation6]  }
  0x68   : > { %p1989_p7 = scmp.ne.s32.totalorder %s2251_s8, %s1988_s23  ;;  %s1993_s21 = sshll.u32 %s2086_s28, 4  ;;  %s1994_s21 = int_to_ptr.vmem [resolvable:$false] %s1993_s21 }
  0x69   : > { %s1995_s22 = scalar_lea.vmem %s1994_s21, 32768  ;;  %p1996_p12 = scmp.lt.s32.totalorder %s2251_s8, %s1994_s21 }
  0x6a   : > { %p1991_p11 = pnand %p1989_p7, %p1975_p5  ;;  %p1997_p8 = scmp.lt.s32.totalorder %s1995_s22, %s1988_s23 }
  0x6c   : > { %p1992_p13 = pneg %p1991_p11  ;;  %p1998_p10 = por %p1997_p8, %p1996_p12 }
  0x6e   : > { %p1999_p0 = pnand %p1998_p10, %p1992_p13 }
  0x70   : > { %2002 = shalt.err (!%p1999_p0)
}
  0x71   : > { %1643 = dma.hbm_to_vmem [thread:$0]  (!%p2491_p2), %s2249_s7, 16384, %s2251_s8, %s2253_s9, %s2082_s14, %s2082_s14, %s2083_s15  }
  0x72   : > { %p2492_p5 = scmp.ne.s32.totalorder %s2487_s26, 0 }
  0x73   : > { %p2493_p9 = scmp.eq.s32.totalorder (!%p2492_p5), %s2132_s19, 0 }
  0x74   : > { %206 = sbr.rel (%p2492_p5) target bundleno = 743 (0x2e7), region = 36 }
  0x7b   : > { %2046 = dma.done.wait (%p2493_p9), [#allocation4], 512   ;;  %p2494_p1 = pmov %p2493_p9 }
  0x7c   : > { %s212_s30 = sand.u32 1, %s2132_s19   ;;  %s214_s10 = sand.u32 1, %s2071_s16  }
  0x7d   : > { %2048 = vsyncadd (%p2494_p1), [#allocation4], 4294966784  ;;  %s1455_s24 = sshll.u32 %s214_s10, 10  ;;  %s213_s5 = scalar_lea.sflag [#allocation7], %s212_s30 }
  0x7e   : > { %s2292_s29 = scalar_lea.vmem [#allocation6], %s1455_s24  ;;  %p2495_p3 = scmp.ne.s32.totalorder %s2486_s25, 0 }
  0x80   : > { %2050 = dma.done.wait (%p2495_p3), %s213_s5, 16384  }
  0x81   : > { %2052 = vsyncadd (%p2495_p3), %s213_s5, 4294950912  ;;  %p2496_p2 = pmov %p2494_p1 }
  0x82   : > { %p2497_p4 = pmov %p2494_p1 }
  0x83   : > { %2054 = dma.done.wait (%p2496_p2), [#allocation7], 512  }
  0x84   : > { %2056 = vsyncadd (%p2497_p4), [#allocation7], 4294966784  ;;  %p2498_p6 = pmov %p2494_p1 }
  0x85   : > { %p2499_p7 = pmov %p2494_p1 }
  0x86   : > { %2058 = dma.done.wait (%p2498_p6), [#allocation10], 256  }
  0x87   : > { %2060 = vsyncadd (%p2499_p7), [#allocation10], 4294967040  ;;  %p2500_p11 = scmp.ne.s32.totalorder %s2132_s19, 0 }
  0x88   : > { %v249_v0 = vld [vmem:[#allocation3] sm:$0xff] (!%p2500_p11)  ;;  %v250_v1 = vld [vmem:[#allocation3 + $0x8] sm:$0xff] (!%p2500_p11)  ;;  %v251_v2 = vld [vmem:[#allocation3 + $0x10] sm:$0xff] (!%p2500_p11) }
  0x89   : > { %248 = sbr.rel (%p2500_p11) target bundleno = 144 (0x90), region = 56  ;;  %253 = vst [vmem:[#allocation2] sm:$0xff] (!%p2500_p11), %v249_v0  ;;  %254 = vst [vmem:[#allocation2 + $0x8] sm:$0xff] (!%p2500_p11), %v250_v1  ;;  %v252_v3 = vld [vmem:[#allocation3 + $0x18] sm:$0xff] (!%p2500_p11) }
  0x8a   : > { %255 = vst [vmem:[#allocation2 + $0x10] sm:$0xff] (!%p2500_p11), %v251_v2  ;;  %256 = vst [vmem:[#allocation2 + $0x18] sm:$0xff] (!%p2500_p11), %v252_v3 }
  0x90 PF: > { %v1691_v4 = vld [vmem:[%s2292_s29 + $0x4] ss:$16 sps:$4 sm:$0xff]   ;;  %v1693_v5 = vld [vmem:[%s2292_s29 + $0xc] ss:$16 sps:$4 sm:$0xff]   ;;  %v1695_v6 = vld [vmem:[%s2292_s29] ss:$16 sps:$4 sm:$0xff]  }
  0x91   : > { %1061 = vmatprep.subr.bf16.mxu0 %v1691_v4  ;;  %v1696_v7 = vld [vmem:[%s2292_s29 + $0x8] ss:$16 sps:$4 sm:$0xff]   ;;  %1143 = vmatprep.subr.bf16.mxu1 %v1693_v5  ;;  %v1697_v8 = vld [vmem:[%s2292_s29 + $0x24] ss:$16 sps:$4 sm:$0xff]   ;;  %v1699_v9 = vld [vmem:[%s2292_s29 + $0x2c] ss:$16 sps:$4 sm:$0xff]  }
  0x92   : > { %1062 = vmatpush1.bf16.msra.mxu0 %v1695_v6  ;;  %1144 = vmatpush1.bf16.msra.mxu1 %v1696_v7  ;;  %v1701_v10 = vld [vmem:[%s2292_s29 + $0x20] ss:$16 sps:$4 sm:$0xff]   ;;  %v1702_v11 = vld [vmem:[%s2292_s29 + $0x28] ss:$16 sps:$4 sm:$0xff]   ;;  %v1703_v12 = vld [vmem:[%s2292_s29 + $0x44] ss:$16 sps:$4 sm:$0xff]  }
  0x93   : > { %1063 = vmatprep.subr.bf16.mxu0 %v1697_v8  ;;  %1145 = vmatprep.subr.bf16.mxu1 %v1699_v9  ;;  %v1705_v13 = vld [vmem:[%s2292_s29 + $0x4c] ss:$16 sps:$4 sm:$0xff]   ;;  %v1707_v14 = vld [vmem:[%s2292_s29 + $0x40] ss:$16 sps:$4 sm:$0xff]   ;;  %v1708_v15 = vld [vmem:[%s2292_s29 + $0x48] ss:$16 sps:$4 sm:$0xff]  }
  0x94   : > { %v1709_v16 = vld [vmem:[%s2292_s29 + $0x64] ss:$16 sps:$4 sm:$0xff]   ;;  %v1711_v17 = vld [vmem:[%s2292_s29 + $0x6c] ss:$16 sps:$4 sm:$0xff]   ;;  %v1713_v18 = vld [vmem:[%s2292_s29 + $0x60] ss:$16 sps:$4 sm:$0xff]  }
  0x95   : > { %v1714_v19 = vld [vmem:[%s2292_s29 + $0x68] ss:$16 sps:$4 sm:$0xff]   ;;  %v1715_v20 = vld [vmem:[%s2292_s29 + $0x84] ss:$16 sps:$4 sm:$0xff]   ;;  %v1717_v21 = vld [vmem:[%s2292_s29 + $0x8c] ss:$16 sps:$4 sm:$0xff]  }
  0x96   : > { %1064 = vmatpush1.bf16.msra.mxu0 %v1701_v10  ;;  %1146 = vmatpush1.bf16.msra.mxu1 %v1702_v11  ;;  %v1719_v22 = vld [vmem:[%s2292_s29 + $0x80] ss:$16 sps:$4 sm:$0xff]   ;;  %v1720_v23 = vld [vmem:[%s2292_s29 + $0x88] ss:$16 sps:$4 sm:$0xff]   ;;  %v1721_v24 = vld [vmem:[%s2292_s29 + $0xa4] ss:$16 sps:$4 sm:$0xff]  }
  0x97   : > { %1065 = vmatprep.subr.bf16.mxu0 %v1703_v12  ;;  %1147 = vmatprep.subr.bf16.mxu1 %v1705_v13  ;;  %v1723_v25 = vld [vmem:[%s2292_s29 + $0xac] ss:$16 sps:$4 sm:$0xff]   ;;  %v1725_v26 = vld [vmem:[%s2292_s29 + $0xa0] ss:$16 sps:$4 sm:$0xff]   ;;  %v1726_v27 = vld [vmem:[%s2292_s29 + $0xa8] ss:$16 sps:$4 sm:$0xff]  }
  0x98   : > { %v1727_v28 = vld [vmem:[%s2292_s29 + $0xc4] ss:$16 sps:$4 sm:$0xff]   ;;  %v1729_v29 = vld [vmem:[%s2292_s29 + $0xcc] ss:$16 sps:$4 sm:$0xff]   ;;  %v1731_v30 = vld [vmem:[%s2292_s29 + $0xc0] ss:$16 sps:$4 sm:$0xff]  }
  0x99   : > { %v1732_v31 = vld [vmem:[%s2292_s29 + $0xc8] ss:$16 sps:$4 sm:$0xff]   ;;  %v1733_v32 = vld [vmem:[%s2292_s29 + $0xe4] ss:$16 sps:$4 sm:$0xff]   ;;  %v1735_v33 = vld [vmem:[%s2292_s29 + $0xec] ss:$16 sps:$4 sm:$0xff]  }
  0x9a   : > { %1066 = vmatpush1.bf16.msra.mxu0 %v1707_v14  ;;  %1148 = vmatpush1.bf16.msra.mxu1 %v1708_v15  ;;  %v1737_v34 = vld [vmem:[%s2292_s29 + $0xe0] ss:$16 sps:$4 sm:$0xff]   ;;  %v1738_v35 = vld [vmem:[%s2292_s29 + $0xe8] ss:$16 sps:$4 sm:$0xff]   ;;  %v1739_v36 = vld [vmem:[%s2292_s29 + $0x104] ss:$16 sps:$4 sm:$0xff]  }
  0x9b   : > { %1067 = vmatprep.subr.bf16.mxu0 %v1709_v16  ;;  %1149 = vmatprep.subr.bf16.mxu1 %v1711_v17  ;;  %v1741_v37 = vld [vmem:[%s2292_s29 + $0x10c] ss:$16 sps:$4 sm:$0xff]   ;;  %v1743_v38 = vld [vmem:[%s2292_s29 + $0x100] ss:$16 sps:$4 sm:$0xff]   ;;  %v1744_v39 = vld [vmem:[%s2292_s29 + $0x108] ss:$16 sps:$4 sm:$0xff]  }
  0x9c   : > { %v1745_v40 = vld [vmem:[%s2292_s29 + $0x124] ss:$16 sps:$4 sm:$0xff]   ;;  %v1747_v41 = vld [vmem:[%s2292_s29 + $0x12c] ss:$16 sps:$4 sm:$0xff]   ;;  %v1749_v42 = vld [vmem:[%s2292_s29 + $0x120] ss:$16 sps:$4 sm:$0xff]  }
  0x9d   : > { %v1750_v43 = vld [vmem:[%s2292_s29 + $0x128] ss:$16 sps:$4 sm:$0xff]   ;;  %v1751_v44 = vld [vmem:[%s2292_s29 + $0x144] ss:$16 sps:$4 sm:$0xff]   ;;  %v1753_v45 = vld [vmem:[%s2292_s29 + $0x14c] ss:$16 sps:$4 sm:$0xff]  }
  0x9e   : > { %1068 = vmatpush1.bf16.msra.mxu0 %v1713_v18  ;;  %1150 = vmatpush1.bf16.msra.mxu1 %v1714_v19  ;;  %v1755_v46 = vld [vmem:[%s2292_s29 + $0x140] ss:$16 sps:$4 sm:$0xff]   ;;  %v1756_v47 = vld [vmem:[%s2292_s29 + $0x148] ss:$16 sps:$4 sm:$0xff]   ;;  %v1757_v48 = vld [vmem:[%s2292_s29 + $0x164] ss:$16 sps:$4 sm:$0xff]  }
  0x9f   : > { %1069 = vmatprep.subr.bf16.mxu0 %v1715_v20  ;;  %1151 = vmatprep.subr.bf16.mxu1 %v1717_v21  ;;  %v1759_v49 = vld [vmem:[%s2292_s29 + $0x16c] ss:$16 sps:$4 sm:$0xff]   ;;  %v1761_v51 = vld [vmem:[%s2292_s29 + $0x160] ss:$16 sps:$4 sm:$0xff]   ;;  %v1762_v53 = vld [vmem:[%s2292_s29 + $0x168] ss:$16 sps:$4 sm:$0xff]  }
  0xa0   : > { %v393_v50 = vld [vmem:[#allocation2 + $0x8] sm:$0xff]  ;;  %v1763_v54 = vld [vmem:[%s2292_s29 + $0x184] ss:$16 sps:$4 sm:$0xff]   ;;  %v1767_v56 = vld [vmem:[%s2292_s29 + $0x180] ss:$16 sps:$4 sm:$0xff]   ;;  %p2501_p13 = scmp.eq.s32.totalorder %s2132_s19, 0 }
  0xa1   : > { %v397_v52 = vpack.c.bf16 %v393_v50, %v393_v50  ;;  %v1765_v55 = vld [vmem:[%s2292_s29 + $0x18c] ss:$16 sps:$4 sm:$0xff]   ;;  %v1768_v57 = vld [vmem:[%s2292_s29 + $0x188] ss:$16 sps:$4 sm:$0xff]   ;;  %v1769_v58 = vld [vmem:[%s2292_s29 + $0x1a4] ss:$16 sps:$4 sm:$0xff]  }
  0xa2   : > { %1070 = vmatpush1.bf16.msra.mxu0 %v1719_v22  ;;  %1152 = vmatpush1.bf16.msra.mxu1 %v1720_v23  ;;  %v1771_v59 = vld [vmem:[%s2292_s29 + $0x1ac] ss:$16 sps:$4 sm:$0xff]   ;;  %v1773_v60 = vld [vmem:[%s2292_s29 + $0x1a0] ss:$16 sps:$4 sm:$0xff]   ;;  %v1774_v61 = vld [vmem:[%s2292_s29 + $0x1a8] ss:$16 sps:$4 sm:$0xff]  }
  0xa3   : > { %1071 = vmatprep.subr.bf16.mxu0 %v1721_v24  ;;  %1153 = vmatprep.subr.bf16.mxu1 %v1723_v25  ;;  %v1775_v62 = vld [vmem:[%s2292_s29 + $0x1c4] ss:$16 sps:$4 sm:$0xff]   ;;  %v1777_v63 = vld [vmem:[%s2292_s29 + $0x1cc] ss:$16 sps:$4 sm:$0xff]   ;;  %v1779_v0 = vld [vmem:[%s2292_s29 + $0x1c0] ss:$16 sps:$4 sm:$0xff]  }
  0xa4   : > { %1093 = vmatprep.mubr.bf16.mxu0 %v397_v52  ;;  %1175 = vmatprep.mubr.bf16.mxu1 %v397_v52  ;;  %v1780_v1 = vld [vmem:[%s2292_s29 + $0x1c8] ss:$16 sps:$4 sm:$0xff]   ;;  %v1781_v2 = vld [vmem:[%s2292_s29 + $0x1e4] ss:$16 sps:$4 sm:$0xff]   ;;  %v1783_v3 = vld [vmem:[%s2292_s29 + $0x1ec] ss:$16 sps:$4 sm:$0xff]  }
  0xa5   : > { %v1785_v4 = vld [vmem:[%s2292_s29 + $0x1e0] ss:$16 sps:$4 sm:$0xff]   ;;  %v1786_v5 = vld [vmem:[%s2292_s29 + $0x1e8] ss:$16 sps:$4 sm:$0xff]   ;;  %v1789_v7 = vld [vmem:[%s2292_s29 + $0x204] ss:$16 sps:$4 sm:$0xff]  }
  0xa6   : > { %1072 = vmatpush1.bf16.msra.mxu0 %v1725_v26  ;;  %1154 = vmatpush1.bf16.msra.mxu1 %v1726_v27  ;;  %v392_v6 = vld [vmem:[#allocation2] sm:$0xff]  ;;  %v1792_v8 = vld [vmem:[%s2292_s29 + $0x20c] ss:$16 sps:$4 sm:$0xff]   ;;  %v1790_v11 = vld [vmem:[%s2292_s29 + $0x208] ss:$16 sps:$4 sm:$0xff]   ;;  %p1587_p12 = scmp.ne.s32.totalorder %s2132_s19, 1 }
  0xa7   : > { %1073 = vmatprep.subr.bf16.mxu0 %v1727_v28  ;;  %1155 = vmatprep.subr.bf16.mxu1 %v1729_v29  ;;  %v396_v9 = vpack.c.bf16 %v392_v6, %v392_v6  ;;  %v1787_v10 = vld [vmem:[%s2292_s29 + $0x200] ss:$16 sps:$4 sm:$0xff]   ;;  %v1795_v12 = vld [vmem:[%s2292_s29 + $0x224] ss:$16 sps:$4 sm:$0xff]   ;;  %v1798_v13 = vld [vmem:[%s2292_s29 + $0x22c] ss:$16 sps:$4 sm:$0xff]  }
  0xa8   : > { %v1793_v14 = vld [vmem:[%s2292_s29 + $0x220] ss:$16 sps:$4 sm:$0xff]   ;;  %v1796_v15 = vld [vmem:[%s2292_s29 + $0x228] ss:$16 sps:$4 sm:$0xff]   ;;  %v1801_v16 = vld [vmem:[%s2292_s29 + $0x244] ss:$16 sps:$4 sm:$0xff]  }
  0xa9   : > { %v1804_v17 = vld [vmem:[%s2292_s29 + $0x24c] ss:$16 sps:$4 sm:$0xff]   ;;  %v1799_v18 = vld [vmem:[%s2292_s29 + $0x240] ss:$16 sps:$4 sm:$0xff]   ;;  %v1802_v19 = vld [vmem:[%s2292_s29 + $0x248] ss:$16 sps:$4 sm:$0xff]  }
  0xaa   : > { %1074 = vmatpush1.bf16.msra.mxu0 %v1731_v30  ;;  %1156 = vmatpush1.bf16.msra.mxu1 %v1732_v31  ;;  %v1807_v20 = vld [vmem:[%s2292_s29 + $0x264] ss:$16 sps:$4 sm:$0xff]   ;;  %v1810_v21 = vld [vmem:[%s2292_s29 + $0x26c] ss:$16 sps:$4 sm:$0xff]   ;;  %v1805_v22 = vld [vmem:[%s2292_s29 + $0x260] ss:$16 sps:$4 sm:$0xff]  }
  0xab   : > { %1075 = vmatprep.subr.bf16.mxu0 %v1733_v32  ;;  %1157 = vmatprep.subr.bf16.mxu1 %v1735_v33  ;;  %v1808_v23 = vld [vmem:[%s2292_s29 + $0x268] ss:$16 sps:$4 sm:$0xff]   ;;  %v1813_v24 = vld [vmem:[%s2292_s29 + $0x284] ss:$16 sps:$4 sm:$0xff]   ;;  %v1816_v25 = vld [vmem:[%s2292_s29 + $0x28c] ss:$16 sps:$4 sm:$0xff]  }
  0xac   : > { %v1811_v26 = vld [vmem:[%s2292_s29 + $0x280] ss:$16 sps:$4 sm:$0xff]   ;;  %v1814_v27 = vld [vmem:[%s2292_s29 + $0x288] ss:$16 sps:$4 sm:$0xff]   ;;  %v1819_v28 = vld [vmem:[%s2292_s29 + $0x2a4] ss:$16 sps:$4 sm:$0xff]  }
  0xad   : > { %v1822_v29 = vld [vmem:[%s2292_s29 + $0x2ac] ss:$16 sps:$4 sm:$0xff]   ;;  %v1817_v30 = vld [vmem:[%s2292_s29 + $0x2a0] ss:$16 sps:$4 sm:$0xff]   ;;  %v1820_v31 = vld [vmem:[%s2292_s29 + $0x2a8] ss:$16 sps:$4 sm:$0xff]  }
  0xae   : > { %1076 = vmatpush1.bf16.msra.mxu0 %v1737_v34  ;;  %1158 = vmatpush1.bf16.msra.mxu1 %v1738_v35  ;;  %v1825_v32 = vld [vmem:[%s2292_s29 + $0x2c4] ss:$16 sps:$4 sm:$0xff]   ;;  %v1828_v33 = vld [vmem:[%s2292_s29 + $0x2cc] ss:$16 sps:$4 sm:$0xff]   ;;  %v1847_v52 = vld [vmem:[%s2292_s29 + $0x340] ss:$16 sps:$4 sm:$0xff]  }
  0xaf   : > { %1077 = vmatprep.subr.bf16.mxu0 %v1739_v36  ;;  %1159 = vmatprep.subr.bf16.mxu1 %v1741_v37  ;;  %v395_v34 = vld [vmem:[#allocation2 + $0x18] sm:$0xff]  ;;  %v1823_v36 = vld [vmem:[%s2292_s29 + $0x2c0] ss:$16 sps:$4 sm:$0xff]   ;;  %v1849_v50 = vld [vmem:[%s2292_s29 + $0x344] ss:$16 sps:$4 sm:$0xff]   ;;  %vm1354_vm1 = vcmask (!%p1587_p12), 80896  }
  0xb0   : > { %v399_v35 = vpack.c.bf16 %v395_v34, %v395_v34  ;;  %v1826_v37 = vld [vmem:[%s2292_s29 + $0x2c8] ss:$16 sps:$4 sm:$0xff]   ;;  %v1879_v6 = vld [vmem:[%s2292_s29 + $0x3e4] ss:$16 sps:$4 sm:$0xff]   ;;  %s388_s25 = scalar_select %p2501_p13, 1, 0 }
  0xb2   : > { %1078 = vmatpush1.bf16.msra.mxu0 %v1743_v38  ;;  %1160 = vmatpush1.bf16.msra.mxu1 %v1744_v39  ;;  %v1831_v38 = vld [vmem:[%s2292_s29 + $0x2e4] ss:$16 sps:$4 sm:$0xff]   ;;  %v1834_v39 = vld [vmem:[%s2292_s29 + $0x2ec] ss:$16 sps:$4 sm:$0xff]  }
  0xb3   : > { %1079 = vmatprep.subr.bf16.mxu0 %v1745_v40  ;;  %1161 = vmatprep.subr.bf16.mxu1 %v1747_v41  ;;  %v1829_v40 = vld [vmem:[%s2292_s29 + $0x2e0] ss:$16 sps:$4 sm:$0xff]   ;;  %v1832_v41 = vld [vmem:[%s2292_s29 + $0x2e8] ss:$16 sps:$4 sm:$0xff]  }
  0xb6   : > { %1080 = vmatpush1.bf16.msra.mxu0 %v1749_v42  ;;  %1162 = vmatpush1.bf16.msra.mxu1 %v1750_v43  ;;  %v1837_v42 = vld [vmem:[%s2292_s29 + $0x304] ss:$16 sps:$4 sm:$0xff]   ;;  %v1840_v43 = vld [vmem:[%s2292_s29 + $0x30c] ss:$16 sps:$4 sm:$0xff]  }
  0xb7   : > { %1081 = vmatprep.subr.bf16.mxu0 %v1751_v44  ;;  %1163 = vmatprep.subr.bf16.mxu1 %v1753_v45  ;;  %v1835_v44 = vld [vmem:[%s2292_s29 + $0x300] ss:$16 sps:$4 sm:$0xff]   ;;  %v1838_v45 = vld [vmem:[%s2292_s29 + $0x308] ss:$16 sps:$4 sm:$0xff]  }
  0xba   : > { %1082 = vmatpush1.bf16.msra.mxu0 %v1755_v46  ;;  %1164 = vmatpush1.bf16.msra.mxu1 %v1756_v47  ;;  %v1843_v46 = vld [vmem:[%s2292_s29 + $0x324] ss:$16 sps:$4 sm:$0xff]   ;;  %v1846_v47 = vld [vmem:[%s2292_s29 + $0x32c] ss:$16 sps:$4 sm:$0xff]  }
  0xbb   : > { %1083 = vmatprep.subr.bf16.mxu0 %v1757_v48  ;;  %1165 = vmatprep.subr.bf16.mxu1 %v1759_v49  ;;  %v1841_v48 = vld [vmem:[%s2292_s29 + $0x320] ss:$16 sps:$4 sm:$0xff]   ;;  %v1844_v49 = vld [vmem:[%s2292_s29 + $0x328] ss:$16 sps:$4 sm:$0xff]  }
  0xbe   : > { %1084 = vmatpush1.bf16.msra.mxu0 %v1761_v51  ;;  %1166 = vmatpush1.bf16.msra.mxu1 %v1762_v53  ;;  %v1852_v51 = vld [vmem:[%s2292_s29 + $0x34c] ss:$16 sps:$4 sm:$0xff]   ;;  %v1850_v53 = vld [vmem:[%s2292_s29 + $0x348] ss:$16 sps:$4 sm:$0xff]  }
  0xbf   : > { %1085 = vmatprep.subr.bf16.mxu0 %v1763_v54  ;;  %1167 = vmatprep.subr.bf16.mxu1 %v1765_v55  ;;  %v1855_v54 = vld [vmem:[%s2292_s29 + $0x364] ss:$16 sps:$4 sm:$0xff]   ;;  %v1858_v55 = vld [vmem:[%s2292_s29 + $0x36c] ss:$16 sps:$4 sm:$0xff]  }
  0xc2   : > { %1086 = vmatpush1.bf16.msra.mxu0 %v1767_v56  ;;  %1168 = vmatpush1.bf16.msra.mxu1 %v1768_v57  ;;  %v1853_v56 = vld [vmem:[%s2292_s29 + $0x360] ss:$16 sps:$4 sm:$0xff]   ;;  %v1856_v57 = vld [vmem:[%s2292_s29 + $0x368] ss:$16 sps:$4 sm:$0xff]  }
  0xc3   : > { %1087 = vmatprep.subr.bf16.mxu0 %v1769_v58  ;;  %1169 = vmatprep.subr.bf16.mxu1 %v1771_v59  ;;  %v1861_v58 = vld [vmem:[%s2292_s29 + $0x384] ss:$16 sps:$4 sm:$0xff]   ;;  %v1864_v59 = vld [vmem:[%s2292_s29 + $0x38c] ss:$16 sps:$4 sm:$0xff]  }
  0xc6   : > { %1088 = vmatpush1.bf16.msra.mxu0 %v1773_v60  ;;  %1170 = vmatpush1.bf16.msra.mxu1 %v1774_v61  ;;  %v1859_v60 = vld [vmem:[%s2292_s29 + $0x380] ss:$16 sps:$4 sm:$0xff]   ;;  %v1862_v61 = vld [vmem:[%s2292_s29 + $0x388] ss:$16 sps:$4 sm:$0xff]  }
  0xc7   : > { %1089 = vmatprep.subr.bf16.mxu0 %v1775_v62  ;;  %1171 = vmatprep.subr.bf16.mxu1 %v1777_v63  ;;  %v1867_v62 = vld [vmem:[%s2292_s29 + $0x3a4] ss:$16 sps:$4 sm:$0xff]   ;;  %v1870_v63 = vld [vmem:[%s2292_s29 + $0x3ac] ss:$16 sps:$4 sm:$0xff]  }
  0xca   : > { %1090 = vmatpush1.bf16.msra.mxu0 %v1779_v0  ;;  %1172 = vmatpush1.bf16.msra.mxu1 %v1780_v1  ;;  %v1865_v0 = vld [vmem:[%s2292_s29 + $0x3a0] ss:$16 sps:$4 sm:$0xff]   ;;  %v1868_v1 = vld [vmem:[%s2292_s29 + $0x3a8] ss:$16 sps:$4 sm:$0xff]  }
  0xcb   : > { %1091 = vmatprep.subr.bf16.mxu0 %v1781_v2  ;;  %1173 = vmatprep.subr.bf16.mxu1 %v1783_v3  ;;  %v1873_v2 = vld [vmem:[%s2292_s29 + $0x3c4] ss:$16 sps:$4 sm:$0xff]   ;;  %v1876_v3 = vld [vmem:[%s2292_s29 + $0x3cc] ss:$16 sps:$4 sm:$0xff]  }
  0xce   : > { %1092 = vmatpush1.bf16.msra.mxu0 %v1785_v4  ;;  %1174 = vmatpush1.bf16.msra.mxu1 %v1786_v5  ;;  %v1871_v4 = vld [vmem:[%s2292_s29 + $0x3c0] ss:$16 sps:$4 sm:$0xff]   ;;  %v1874_v5 = vld [vmem:[%s2292_s29 + $0x3c8] ss:$16 sps:$4 sm:$0xff]  }
  0xcf   : > { %1102 = vmatprep.subr.bf16.mxu0 %v1789_v7  ;;  %1184 = vmatprep.subr.bf16.mxu1 %v1792_v8  ;;  %v1882_v7 = vld [vmem:[%s2292_s29 + $0x3ec] ss:$16 sps:$4 sm:$0xff]   ;;  %v1877_v8 = vld [vmem:[%s2292_s29 + $0x3e0] ss:$16 sps:$4 sm:$0xff]  }
  0xd1   : > { %1094 = vmatmul.mubr.bf16.vlgmr.msra.gmra.mrb[0].mxu0 %v396_v9  ;;  %1176 = vmatmul.mubr.bf16.vlgmr.msra.gmra.mrb[0].mxu1 %v396_v9  ;;  %v1880_v9 = vld [vmem:[%s2292_s29 + $0x3e8] ss:$16 sps:$4 sm:$0xff]  }
  0xd2   : > { %1103 = vmatpush1.bf16.msra.mxu0 %v1787_v10  ;;  %1185 = vmatpush1.bf16.msra.mxu1 %v1790_v11  ;;  %v394_v10 = vld [vmem:[#allocation2 + $0x10] sm:$0xff] }
  0xd3   : > { %1104 = vmatprep.subr.bf16.mxu0 %v1795_v12  ;;  %1186 = vmatprep.subr.bf16.mxu1 %v1798_v13  ;;  %v398_v11 = vpack.c.bf16 %v394_v10, %v394_v10  ;;  %v401_v12 = vlaneseq  ;;  %v389_v13 = vstv %s388_s25 }
  0xd4   : > { %1134 = vmatprep.mubr.bf16.mxu0 %v399_v35  ;;  %1216 = vmatprep.mubr.bf16.mxu1 %v399_v35  ;;  %vm390_vm0 = vcmp.eq.s32.totalorder %v389_v13, 1 }
  0xd6   : > { %1105 = vmatpush1.bf16.msra.mxu0 %v1793_v14  ;;  %1187 = vmatpush1.bf16.msra.mxu1 %v1796_v15  ;;  %v402_v14 = vshrl.u32 %v401_v12, 7  ;;  %v385_v15 = vld [vmem:[#allocation9] ss:$4 sm:$0xf] }
  0xd7   : > { %1106 = vmatprep.subr.bf16.mxu0 %v1801_v16  ;;  %1188 = vmatprep.subr.bf16.mxu1 %v1804_v17  ;;  %v387_v16 = vld [vmem:[#allocation9 + $0x1] ss:$4 sm:$0xf] }
  0xd8   : > { %v403_v17 = vsub.s32 0, %v402_v14 }
  0xda   : > { %1107 = vmatpush1.bf16.msra.mxu0 %v1799_v18  ;;  %1189 = vmatpush1.bf16.msra.mxu1 %v1802_v19  ;;  %v411_v18 = vsub.s32 2, %v402_v14  ;;  %v391_v19 = vsel %vm390_vm0, %v385_v15, %v387_v16 }
  0xdb   : > { %1108 = vmatprep.subr.bf16.mxu0 %v1807_v20  ;;  %1190 = vmatprep.subr.bf16.mxu1 %v1810_v21  ;;  %v407_v20 = vsub.s32 1, %v402_v14  ;;  %v415_v21 = vsub.s32 3, %v402_v14 }
  0xde   : > { %1109 = vmatpush1.bf16.msra.mxu0 %v1805_v22  ;;  %1191 = vmatpush1.bf16.msra.mxu1 %v1808_v23  ;;  %v404_v22 = vrot.slane %v391_v19, %v403_v17  ;;  %v412_v23 = vrot.slane %v391_v19, %v411_v18 }
  0xdf   : > { %1110 = vmatprep.subr.bf16.mxu0 %v1813_v24  ;;  %1192 = vmatprep.subr.bf16.mxu1 %v1816_v25  ;;  %v408_v24 = vrot.slane %v391_v19, %v407_v20  ;;  %v416_v25 = vrot.slane %v391_v19, %v415_v21 }
  0xe2   : > { %1111 = vmatpush1.bf16.msra.mxu0 %v1811_v26  ;;  %1193 = vmatpush1.bf16.msra.mxu1 %v1814_v27 }
  0xe3   : > { %1112 = vmatprep.subr.bf16.mxu0 %v1819_v28  ;;  %1194 = vmatprep.subr.bf16.mxu1 %v1822_v29 }
  0xe6   : > { %1113 = vmatpush1.bf16.msra.mxu0 %v1817_v30  ;;  %1195 = vmatpush1.bf16.msra.mxu1 %v1820_v31 }
  0xe7   : > { %1114 = vmatprep.subr.bf16.mxu0 %v1825_v32  ;;  %1196 = vmatprep.subr.bf16.mxu1 %v1828_v33 }
  0xea   : > { %1115 = vmatpush1.bf16.msra.mxu0 %v1823_v36  ;;  %1197 = vmatpush1.bf16.msra.mxu1 %v1826_v37 }
  0xeb   : > { %1116 = vmatprep.subr.bf16.mxu0 %v1831_v38  ;;  %1198 = vmatprep.subr.bf16.mxu1 %v1834_v39 }
  0xee   : > { %1117 = vmatpush1.bf16.msra.mxu0 %v1829_v40  ;;  %1199 = vmatpush1.bf16.msra.mxu1 %v1832_v41 }
  0xef   : > { %1118 = vmatprep.subr.bf16.mxu0 %v1837_v42  ;;  %1200 = vmatprep.subr.bf16.mxu1 %v1840_v43  ;;  %v1883_v42 = vld [vmem:[#allocation8 + $0x4] ss:$16 sps:$4 sm:$0x1f] (!%p1587_p12)   ;;  %v1885_v43 = vld [vmem:[#allocation8 + $0xc] ss:$16 sps:$4 sm:$0x1f] (!%p1587_p12)  }
  0xf2   : > { %1119 = vmatpush1.bf16.msra.mxu0 %v1835_v44  ;;  %1201 = vmatpush1.bf16.msra.mxu1 %v1838_v45  ;;  %v1887_v44 = vld [vmem:[#allocation8] ss:$16 sps:$4 sm:$0x1f] (!%p1587_p12)   ;;  %v1888_v45 = vld [vmem:[#allocation8 + $0x8] ss:$16 sps:$4 sm:$0x1f] (!%p1587_p12)  }
  0xf3   : > { %1120 = vmatprep.subr.bf16.mxu0 %v1843_v46  ;;  %1202 = vmatprep.subr.bf16.mxu1 %v1846_v47 }
  0xf6   : > { %1121 = vmatpush1.bf16.msra.mxu0 %v1841_v48  ;;  %1203 = vmatpush1.bf16.msra.mxu1 %v1844_v49 }
  0xf7   : > { %1122 = vmatprep.subr.bf16.mxu0 %v1849_v50  ;;  %1204 = vmatprep.subr.bf16.mxu1 %v1852_v51 }
  0xfa   : > { %1123 = vmatpush1.bf16.msra.mxu0 %v1847_v52  ;;  %1205 = vmatpush1.bf16.msra.mxu1 %v1850_v53 }
  0xfb   : > { %1124 = vmatprep.subr.bf16.mxu0 %v1855_v54  ;;  %1206 = vmatprep.subr.bf16.mxu1 %v1858_v55  ;;  %v1588_v54 = vld [vmem:[#allocation9 + $0x2] ss:$0 sm:$0xff] (!%p1587_p12) }
  0xfe   : > { %1125 = vmatpush1.bf16.msra.mxu0 %v1853_v56  ;;  %1207 = vmatpush1.bf16.msra.mxu1 %v1856_v57 }
  0xff   : > { %1126 = vmatprep.subr.bf16.mxu0 %v1861_v58  ;;  %1208 = vmatprep.subr.bf16.mxu1 %v1864_v59 }
 0x102   : > { %1127 = vmatpush1.bf16.msra.mxu0 %v1859_v60  ;;  %1209 = vmatpush1.bf16.msra.mxu1 %v1862_v61 }
 0x103   : > { %1128 = vmatprep.subr.bf16.mxu0 %v1867_v62  ;;  %1210 = vmatprep.subr.bf16.mxu1 %v1870_v63 }
 0x106   : > { %1129 = vmatpush1.bf16.msra.mxu0 %v1865_v0  ;;  %1211 = vmatpush1.bf16.msra.mxu1 %v1868_v1 }
 0x107   : > { %1130 = vmatprep.subr.bf16.mxu0 %v1873_v2  ;;  %1212 = vmatprep.subr.bf16.mxu1 %v1876_v3 }
 0x10a   : > { %1131 = vmatpush1.bf16.msra.mxu0 %v1871_v4  ;;  %1213 = vmatpush1.bf16.msra.mxu1 %v1874_v5 }
 0x10b   : > { %1132 = vmatprep.subr.bf16.mxu0 %v1879_v6  ;;  %1214 = vmatprep.subr.bf16.mxu1 %v1882_v7 }
 0x10e   : > { %1133 = vmatpush1.bf16.msra.mxu0 %v1877_v8  ;;  %1215 = vmatpush1.bf16.msra.mxu1 %v1880_v9 }
 0x10f   : > { %1274 = vmatprep.subr.bf16.mxu1 (!%p1587_p12), %v1883_v42  ;;  %1314 = vmatprep.subr.bf16.mxu0 (!%p1587_p12), %v1885_v43 }
 0x111   : > { %1135 = vmatmul.mubr.bf16.vlgmr.msra.gmra.mrb[0].mxu0 %v398_v11  ;;  %1217 = vmatmul.mubr.bf16.vlgmr.msra.gmra.mrb[0].mxu1 %v398_v11 }
 0x117   : > { %1275 = vmatpush1.bf16.xpose.msra.mxu1 (!%p1587_p12), %v1887_v44  ;;  %1315 = vmatpush1.bf16.xpose.msra.mxu0 (!%p1587_p12), %v1888_v45 }
 0x1e4   : > { %v1136_v26 = vpop.f32.mrb[0].mxu0  ;;  %v1218_v27 = vpop.f32.mrb[0].mxu1  ;;  %1236 = sbr.rel (%p1587_p12) target bundleno = 718 (0x2ce), region = 60 }
 0x1e5   : > { %v1598_v28 = vadd.f32 %v1136_v26, %v404_v22  ;;  %v1600_v29 = vadd.f32 %v1218_v27, %v412_v23  ;;  %v1138_v30 = vpop.f32.mrb[1].mxu0  ;;  %v1220_v31 = vpop.f32.mrb[1].mxu1 }
 0x1e6   : > { %v1599_v32 = vadd.f32 %v1138_v30, %v408_v24  ;;  %v1601_v33 = vadd.f32 %v1220_v31, %v416_v25  ;;  %v1140_v34 = vpop.f32.mrb[2].mxu0  ;;  %v1222_v35 = vpop.f32.mrb[2].mxu1 }
 0x1e7   : > { %v1225_v36 = vmax.f32 %v1598_v28, 0.0  ;;  %v1227_v37 = vmax.f32 %v1600_v29, 0.0  ;;  %v1141_v38 = vpop.f32.mrb[3].mxu0  ;;  %v1223_v39 = vpop.f32.mrb[3].mxu1 }
 0x1e8   : > { %v1226_v40 = vmax.f32 %v1599_v32, 0.0  ;;  %v1228_v41 = vmax.f32 %v1601_v33, 0.0 }
 0x1e9   : > { %1229 = vst [vmem:[#allocation2] sm:$0xff] %v1225_v36  ;;  %1231 = vst [vmem:[#allocation2 + $0x10] sm:$0xff] %v1227_v37 }
 0x1ea   : > { %1230 = vst [vmem:[#allocation2 + $0x8] sm:$0xff] %v1226_v40  ;;  %1232 = vst [vmem:[#allocation2 + $0x18] sm:$0xff] %v1228_v41 }
 0x1f0   : > { %v1237_v50 = vld [vmem:[#allocation2] sm:$0xff]  ;;  %v1239_v51 = vld [vmem:[#allocation2 + $0x10] sm:$0xff] }
 0x1f1   : > { %v1238_v46 = vld [vmem:[#allocation2 + $0x8] sm:$0xff]  ;;  %v1240_v47 = vld [vmem:[#allocation2 + $0x18] sm:$0xff]  ;;  %v1241_v52 = vpack.c.bf16 %v1237_v50, %v1237_v50  ;;  %v1243_v53 = vpack.c.bf16 %v1239_v51, %v1239_v51 }
 0x1f2   : > { %v1242_v48 = vpack.c.bf16 %v1238_v46, %v1238_v46  ;;  %v1244_v49 = vpack.c.bf16 %v1240_v47, %v1240_v47 }
 0x1f4   : > { %1306 = vmatprep.mubr.bf16.mxu1 %v1242_v48  ;;  %1346 = vmatprep.mubr.bf16.mxu0 %v1244_v49 }
 0x1f5   : > { %1307 = vmatmul.mubr.bf16.vlgmr.msra.gmra.mrb[0].mxu1 %v1241_v52  ;;  %1347 = vmatmul.mubr.bf16.vlgmr.msra.gmra.mrb[0].mxu0 %v1243_v53 }
 0x2c8   : > { %v1308_v55 = vpop.f32.mrb[0].mxu1  ;;  %v1348_v56 = vpop.f32.mrb[0].mxu0 }
 0x2c9   : > { %v1309_v57 = vadd.f32 %v1588_v54, %v1308_v55  ;;  %v1310_v58 = vpop.f32.mrb[1].mxu1  ;;  %v1350_v59 = vpop.f32.mrb[1].mxu0 }
 0x2ca   : > { %v1311_v60 = vpop.f32.mrb[2].mxu1  ;;  %v1351_v61 = vpop.f32.mrb[2].mxu0 }
 0x2cb   : > { %v1349_v62 = vadd.f32 %v1348_v56, %v1309_v57  ;;  %v1312_v63 = vpop.f32.mrb[3].mxu1  ;;  %v1352_v0 = vpop.f32.mrb[3].mxu0 }
 0x2cd   : > { %1355 = vst.msk [vmem:[#allocation11] sm:$0xff] %vm1354_vm1, %v1349_v62 }
 0x2ce PF: > { %p1651_p8 = scmp.eq.s32.totalorder %s2132_s19, 1  ;;  %s2087_s26 = smov [#allocation11]  }
 0x2cf   : > { %s1363_s14 = sshll.u32 %s2087_s26, 4  ;;  %s1364_s14 = int_to_ptr.vmem [resolvable:$true] %s1363_s14 }
 0x2d0   : > { %s2003_s15 = scalar_lea.vmem %s1364_s14, 128  ;;  %p2010_p9 = scmp.lt.s32.totalorder %s1364_s14, %s1364_s14 }
 0x2d1   : > { %p2004_p10 = scmp.ne.s32.totalorder %s1364_s14, %s2003_s15  ;;  %p2011_p1 = scmp.lt.s32.totalorder %s2003_s15, %s2003_s15 }
 0x2d3   : > { %p2005_p0 = pnand %p2004_p10, %p1651_p8  ;;  %p2012_p3 = por %p2011_p1, %p2010_p9 }
 0x2d5   : > { %p2006_p5 = pneg %p2005_p0 }
 0x2d7   : > { %p2013_p2 = pnand %p2012_p3, %p2006_p5 }
 0x2d9   : > { %2016 = shalt.err (!%p2013_p2)
}
 0x2da   : > { %s2017_s9 = scalar_lea.hbm %s2479_s4, 128 }
 0x2db   : > { %p2018_p4 = scmp.ne.s32.totalorder %s2479_s4, %s2017_s9  ;;  %p2023_p11 = scmp.lt.u32.totalorder %s2017_s9, %s2479_s4 }
 0x2dd   : > { %p2019_p6 = pnand %p2018_p4, %p1651_p8 }
 0x2df   : > { %p2020_p7 = pneg %p2019_p6 }
 0x2e1   : > { %p2025_p13 = pnand %p2023_p11, %p2020_p7 }
 0x2e3   : > { %2028 = shalt.err (!%p2025_p13)
}
 0x2e4   : > { %1627 = dma.vmem_to_hbm [thread:$0]  (%p1651_p8), %s1364_s14, 128, %s2479_s4, [#allocation5]  }
 0x2e5   : > { %2062 = dma.done.wait (%p1651_p8), [#allocation5], 128  }
 0x2e6   : > { %2064 = vsyncadd (%p1651_p8), [#allocation5], 4294967168 }
 0x2e7 PF: > { %s2502_s23 = sld [smem:[#allocation17_spill]]  ;;  %p17_p12 = scmp.ge.s32.totalorder %s2135_s20, 4  }
 0x2e8   : > { %s2503_s15 = smov %s2071_s16  ;;  %s2504_s16 = smov %s2075_s17 }
 0x2e9   : > { %s2506_s18 = smov %s2135_s20  ;;  %19 = sbr.rel (!%p17_p12) target bundleno = 6 (0x6), region = 95 }
 0x2ed   : > { %s2505_s17 = smov %s2502_s23 }
 0x2f0   :  { %1376 = vsyncpa [#allocation4], 1 }
 0x2f1   :  { %1378 = vsyncpa [#allocation4 + $0x1], 1 }
 0x2f2   :  { %1379 = vsyncpa [#allocation7], 1 }
 0x2f3   :  { %1381 = vsyncpa [#allocation7 + $0x1], 1 }
 0x2f4   :  { %1382 = vsyncpa [#allocation10], 1 }
 0x2f5   :  { %1383 = vsyncpa [#allocation5], 1 }
 0x2f6   :  { %1385 = vsyncpa [#allocation5 + $0x1], 1 }

</bundles_post_ra>
